<compile_context>
chip_gen: v5e
topology: v5e:2x2
jax: 0.10.0
libtpu: 0.0.40
codegen_flags: <defaults>
</compile_context>

<pallas_src>
import functools

import jax
import jax.numpy as jnp
from jax.experimental import pallas as pl
from jax.experimental.pallas import tpu as pltpu

_LANE = 128


def _round_up(x, m):
    return (x + m - 1) // m * m


def _pick_tiles(n):
    """Padded node count and tile size (tile divides n_pad, 128/256 aligned)."""
    n_pad = max(_round_up(n, _LANE), _LANE)
    tile = 256 if (n_pad % 256 == 0) else _LANE
    return n_pad, tile


def _pad2d(a, rows, cols):
    r, c = a.shape
    return jnp.pad(a, ((0, rows - r), (0, cols - c)))


# ---------------------------------------------------------------------------
# Pallas kernel: one GCN layer, one (row-tile, K-tile) grid step.
#   out[i] = relu( sum_k A[i,k] @ (X[k] @ W) + b )
# ---------------------------------------------------------------------------
def _gcn_layer_kernel(a_ref, x_ref, w_ref, b_ref, o_ref, acc_ref):
    k = pl.program_id(1)

    @pl.when(k == 0)
    def _init():
        acc_ref[...] = jnp.zeros_like(acc_ref)

    # Per-K-tile XW: (TK, D_in) @ (D_in, D_out) -> (TK, D_out), f32 accumulate.
    xw = jnp.dot(x_ref[...], w_ref[...], preferred_element_type=jnp.float32)
    # bf16 A block against bf16 XW on the MXU, f32 accumulation in VMEM scratch.
    acc_ref[...] += jnp.dot(a_ref[...], xw.astype(a_ref.dtype),
                            preferred_element_type=jnp.float32)

    # Bias + ReLU only once, in the finalize branch (lane-dense store).
    @pl.when(k == pl.num_programs(1) - 1)
    def _finalize():
        o_ref[...] = jnp.maximum(acc_ref[...] + b_ref[...], 0.0).astype(o_ref.dtype)


def gcn_layer(a_hat, x, w, b, *, tile):
    """One GCNConv + ReLU on padded operands. a_hat: (Np,Np) bf16, x: (Np,Di) f32,
    w: (Di,Do) f32, b: (1,Do) f32.  Returns (Np, Do) f32."""
    n_pad = a_hat.shape[0]
    d_in = x.shape[1]
    d_out = w.shape[1]
    grid_m = n_pad // tile
    grid_k = n_pad // tile

    flops = int(grid_m * 2 * n_pad * d_in * d_out      # per-row-tile XW recompute
                + 2 * n_pad * n_pad * d_out)           # A @ XW
    bytes_accessed = int(n_pad * n_pad * a_hat.dtype.itemsize   # A_hat (bf16)
                         + grid_m * n_pad * d_in * 4            # X re-read per row tile
                         + d_in * d_out * 4 + d_out * 4         # W, b
                         + n_pad * d_out * 4)                   # output

    return pl.pallas_call(
        _gcn_layer_kernel,
        out_shape=jax.ShapeDtypeStruct((n_pad, d_out), jnp.float32),
        grid_spec=pltpu.PrefetchScalarGridSpec(
            num_scalar_prefetch=0,
            grid=(grid_m, grid_k),
            in_specs=[
                pl.BlockSpec((tile, tile), lambda i, kk: (i, kk)),   # A_hat block
                pl.BlockSpec((tile, d_in), lambda i, kk: (kk, 0)),   # X K-block
                pl.BlockSpec((d_in, d_out), lambda i, kk: (0, 0)),   # W (resident)
                pl.BlockSpec((1, d_out), lambda i, kk: (0, 0)),      # bias (resident)
            ],
            out_specs=pl.BlockSpec((tile, d_out), lambda i, kk: (i, 0)),
            scratch_shapes=[pltpu.VMEM((tile, d_out), jnp.float32)],
        ),
        compiler_params=pltpu.CompilerParams(
            dimension_semantics=("parallel", "arbitrary"),
            vmem_limit_bytes=32 * 1024 * 1024,
        ),
        cost_estimate=pl.CostEstimate(
            flops=flops, transcendentals=0, bytes_accessed=bytes_accessed),
    )(a_hat, x, w, b)


# ---------------------------------------------------------------------------
# Glue: build normalized adjacency  D^{-1/2} (A + I) D^{-1/2}  from edge_index,
# zero-padded to (n_pad, n_pad), stored in bf16 (halves HBM traffic per layer).
# ---------------------------------------------------------------------------
def build_norm_adj(edge_index, num_nodes, num_nodes_pad):
    src = edge_index[0]
    dst = edge_index[1]
    loops = jnp.arange(num_nodes, dtype=edge_index.dtype)
    src = jnp.concatenate([src, loops])
    dst = jnp.concatenate([dst, loops])
    # A[dst, src] accumulates messages src -> dst; padded rows/cols stay zero.
    a = jnp.zeros((num_nodes_pad, num_nodes_pad), jnp.float32).at[dst, src].add(1.0)
    deg = a.sum(axis=1)                       # in-degree incl. self loop
    dinv = jnp.where(deg > 0, 1.0 / jnp.sqrt(deg), 0.0)
    a_hat = dinv[:, None] * a * dinv[None, :]  # D^{-1/2} A D^{-1/2}
    return a_hat.astype(jnp.bfloat16)


# ---------------------------------------------------------------------------
# GCNModule: k layers of (GCNConv -> ReLU)
# ---------------------------------------------------------------------------
def init_gcn_params(key, input_dim, k, hid_dim):
    params = []
    for i in range(k):
        d_in = input_dim if i == 0 else hid_dim
        key, kw = jax.random.split(key)
        scale = jnp.sqrt(2.0 / (d_in + hid_dim))
        w = jax.random.normal(kw, (d_in, hid_dim), jnp.float32) * scale
        b = jnp.zeros((hid_dim,), jnp.float32)
        params.append((w, b))
    return params


@functools.partial(jax.jit, static_argnames=("num_nodes",))
def gcn_module_forward(x, edge_index, params, num_nodes):
    n = num_nodes
    n_pad, tile = _pick_tiles(n)
    d_in = x.shape[1]
    hid_dim = params[0][0].shape[1]
    d_in_pad = max(_round_up(d_in, _LANE), _LANE)
    d_hid_pad = max(_round_up(hid_dim, _LANE), _LANE)

    a_hat = build_norm_adj(edge_index, n, n_pad)
    h = _pad2d(x.astype(jnp.float32), n_pad, d_in_pad)
    for li, (w, b) in enumerate(params):
        din_p = d_in_pad if li == 0 else d_hid_pad
        w_p = _pad2d(w, din_p, d_hid_pad)
        b_p = _pad2d(b.reshape(1, -1), 1, d_hid_pad)
        h = gcn_layer(a_hat, h, w_p, b_p, tile=tile)   # relu(A_hat @ h @ W + b)
    return h[:n, :hid_dim]


# ---------------------------------------------------------------------------
if __name__ == "__main__":
    key = jax.random.PRNGKey(0)

    num_nodes = 8
    input_dim = 16
    hid_dim = 32
    k = 2
    num_edges = 24

    k_x, k_e, k_p = jax.random.split(key, 3)
    x = jax.random.normal(k_x, (num_nodes, input_dim), jnp.float32)
    edge_index = jax.random.randint(k_e, (2, num_edges), 0, num_nodes,
                                    dtype=jnp.int32)

    params = init_gcn_params(k_p, input_dim, k, hid_dim)

    out = gcn_module_forward(x, edge_index, params, num_nodes)
    jax.block_until_ready(out)
    assert out.shape == (num_nodes, hid_dim)
    print("KERNEL_OK")
</pallas_src>

<mosaic_0001>
module attributes {stable_mosaic.version = 11 : i64} {
  func.func @_gcn_layer_kernel(%arg0: i32, %arg1: i32, %arg2: memref<128x128xbf16, #tpu.memory_space<vmem>>, %arg3: memref<128x128xf32, #tpu.memory_space<vmem>>, %arg4: memref<128x128xf32, #tpu.memory_space<vmem>>, %arg5: memref<1x128xf32, #tpu.memory_space<vmem>>, %arg6: memref<128x128xf32, #tpu.memory_space<vmem>>, %arg7: memref<128x128xf32, #tpu.memory_space<vmem>>) attributes {dimension_semantics = [#tpu.dimension_semantics<parallel>, #tpu.dimension_semantics<arbitrary>], iteration_bounds = array<i64: 1, 1>, scalar_prefetch = 0 : i64, scratch_operands = 1 : i64, tpu.core_type = #tpu.core_type<tc>, window_params = [{transform_indices = @transform_0, window_bounds = array<i64: 128, 128>}, {transform_indices = @transform_1, window_bounds = array<i64: 128, 128>}, {pipeline_mode = #tpu.pipeline_mode<synchronous>, transform_indices = @transform_2, window_bounds = array<i64: 128, 128>}, {pipeline_mode = #tpu.pipeline_mode<synchronous>, transform_indices = @transform_3, window_bounds = array<i64: 1, 128>}, {transform_indices = @transform_4, window_bounds = array<i64: 128, 128>}]} {
    %c0_i32 = arith.constant 0 : i32
    %0 = arith.cmpi eq, %arg1, %c0_i32 : i32
    %1 = arith.extui %0 : i1 to i32
    %c0_i32_0 = arith.constant 0 : i32
    %2 = arith.cmpi ne, %1, %c0_i32_0 : i32
    scf.if %2 {
      %cst_13 = arith.constant 0.000000e+00 : f32
      %15 = vector.broadcast %cst_13 : f32 to vector<128x128xf32>
      %c0_14 = arith.constant 0 : index
      %c0_15 = arith.constant 0 : index
      %16 = vector.load %arg7[%c0_14, %c0_15] : memref<128x128xf32, #tpu.memory_space<vmem>>, vector<128x128xf32>
      tpu.vector_store %arg7[%c0_14, %c0_15], %15 {strides = array<i32>} : memref<128x128xf32, #tpu.memory_space<vmem>>, vector<128x128xf32>,
    } else {
    }
    %c0 = arith.constant 0 : index
    %c0_1 = arith.constant 0 : index
    %3 = vector.load %arg3[%c0, %c0_1] : memref<128x128xf32, #tpu.memory_space<vmem>>, vector<128x128xf32>
    %c0_2 = arith.constant 0 : index
    %c0_3 = arith.constant 0 : index
    %4 = vector.load %arg4[%c0_2, %c0_3] : memref<128x128xf32, #tpu.memory_space<vmem>>, vector<128x128xf32>
    %cst = arith.constant dense<0.000000e+00> : vector<128x128xf32>
    %5 = tpu.matmul %3, %4, %cst {dimension_numbers = #tpu.dot_dimension_numbers<[1], [0], [0], [1], [0, 0, 1, 1], [], []>} : vector<128x128xf32>, vector<128x128xf32>, vector<128x128xf32> -> vector<128x128xf32>
    %c0_4 = arith.constant 0 : index
    %c0_5 = arith.constant 0 : index
    %6 = vector.load %arg7[%c0_4, %c0_5] : memref<128x128xf32, #tpu.memory_space<vmem>>, vector<128x128xf32>
    %c0_6 = arith.constant 0 : index
    %c0_7 = arith.constant 0 : index
    %7 = vector.load %arg2[%c0_6, %c0_7] : memref<128x128xbf16, #tpu.memory_space<vmem>>, vector<128x128xbf16>
    %8 = arith.truncf %5 : vector<128x128xf32> to vector<128x128xbf16>
    %cst_8 = arith.constant dense<0.000000e+00> : vector<128x128xf32>
    %9 = tpu.matmul %7, %8, %cst_8 {dimension_numbers = #tpu.dot_dimension_numbers<[1], [0], [0], [1], [0, 0, 1, 1], [], []>} : vector<128x128xbf16>, vector<128x128xbf16>, vector<128x128xf32> -> vector<128x128xf32>
    %10 = arith.addf %6, %9 : vector<128x128xf32>
    %c0_9 = arith.constant 0 : index
    %c0_10 = arith.constant 0 : index
    %11 = vector.load %arg7[%c0_9, %c0_10] : memref<128x128xf32, #tpu.memory_space<vmem>>, vector<128x128xf32>
    tpu.vector_store %arg7[%c0_9, %c0_10], %10 {strides = array<i32>} : memref<128x128xf32, #tpu.memory_space<vmem>>, vector<128x128xf32>,
    %c0_i32_11 = arith.constant 0 : i32
    %12 = arith.cmpi eq, %arg1, %c0_i32_11 : i32
    %13 = arith.extui %12 : i1 to i32
    %c0_i32_12 = arith.constant 0 : i32
    %14 = arith.cmpi ne, %13, %c0_i32_12 : i32
    scf.if %14 {
      %c0_13 = arith.constant 0 : index
      %c0_14 = arith.constant 0 : index
      %15 = vector.load %arg7[%c0_13, %c0_14] : memref<128x128xf32, #tpu.memory_space<vmem>>, vector<128x128xf32>
      %c0_15 = arith.constant 0 : index
      %c0_16 = arith.constant 0 : index
      %16 = vector.load %arg5[%c0_15, %c0_16] : memref<1x128xf32, #tpu.memory_space<vmem>>, vector<1x128xf32>
      %17 = vector.broadcast %16 : vector<1x128xf32> to vector<128x128xf32>
      %18 = arith.addf %15, %17 : vector<128x128xf32>
      %cst_17 = arith.constant 0.000000e+00 : f32
      %19 = vector.broadcast %cst_17 : f32 to vector<128x128xf32>
      %20 = arith.maximumf %18, %19 : vector<128x128xf32>
      %c0_18 = arith.constant 0 : index
      %c0_19 = arith.constant 0 : index
      %21 = vector.load %arg6[%c0_18, %c0_19] : memref<128x128xf32, #tpu.memory_space<vmem>>, vector<128x128xf32>
      tpu.vector_store %arg6[%c0_18, %c0_19], %20 {strides = array<i32>} : memref<128x128xf32, #tpu.memory_space<vmem>>, vector<128x128xf32>,
    } else {
    }
    return
  }
  func.func @transform_0(%arg0: i32, %arg1: i32) -> (i32, i32) {
    %c0_i32 = arith.constant 0 : i32
    return %arg0, %arg1 : i32, i32
  }
  func.func @transform_1(%arg0: i32, %arg1: i32) -> (i32, i32) {
    %c0_i32 = arith.constant 0 : i32
    %c0_i32_0 = arith.constant 0 : i32
    return %arg1, %c0_i32 : i32, i32
  }
  func.func @transform_2(%arg0: i32, %arg1: i32) -> (i32, i32) {
    %c0_i32 = arith.constant 0 : i32
    %c0_i32_0 = arith.constant 0 : i32
    %c0_i32_1 = arith.constant 0 : i32
    return %c0_i32, %c0_i32_0 : i32, i32
  }
  func.func @transform_3(%arg0: i32, %arg1: i32) -> (i32, i32) {
    %c0_i32 = arith.constant 0 : i32
    %c0_i32_0 = arith.constant 0 : i32
    %c0_i32_1 = arith.constant 0 : i32
    return %c0_i32, %c0_i32_0 : i32, i32
  }
  func.func @transform_4(%arg0: i32, %arg1: i32) -> (i32, i32) {
    %c0_i32 = arith.constant 0 : i32
    %c0_i32_0 = arith.constant 0 : i32
    return %arg0, %c0_i32 : i32, i32
  }
}

</mosaic_0001>

<bundles_post_ra>
// kernel: gcn_module_forward.2
= control target key start
LH: loop header
LB: loop body
LE: loop exit
PB: predicated region body
PF: predicated region fallthrough
CT: control target
= control target key end

     0   :  { %s657_s2 = inlined_call_operand.vmem [shape: f32[128,128], index: 2, kind: input, shape index: {}]   ;;  %s658_s1 = inlined_call_operand.vmem [shape: f32[128,128], index: 1, kind: input, shape index: {}]   ;;  %s659_s3 = inlined_call_operand.vmem [shape: f32[1,128], index: 3, kind: input, shape index: {}]   ;;  %s660_s0 = inlined_call_operand.vmem [shape: bf16[128,128], index: 0, kind: input, shape index: {}]   ;;  %s661_s4 = inlined_call_operand.vmem [shape: f32[128,128], index: 4, kind: output, shape index: {}]  }
   0x1   :  { %v68_v0 = vld [vmem:[%s657_s2 + $0x78] sm:$0xff]  ;;  %v67_v1 = vld [vmem:[%s657_s2 + $0x70] sm:$0xff]  ;;  %v66_v2 = vld [vmem:[%s657_s2 + $0x68] sm:$0xff] }
   0x2   :  { %418 = vmatpush.msra.mxu2 %v68_v0  ;;  %69 = vmatpush.msra.mxu0 %v68_v0  ;;  %v65_v3 = vld [vmem:[%s657_s2 + $0x60] sm:$0xff]  ;;  %v64_v4 = vld [vmem:[%s657_s2 + $0x58] sm:$0xff]  ;;  %v63_v5 = vld [vmem:[%s657_s2 + $0x50] sm:$0xff] }
   0x3   :  { %v62_v6 = vld [vmem:[%s657_s2 + $0x48] sm:$0xff]  ;;  %v61_v7 = vld [vmem:[%s657_s2 + $0x40] sm:$0xff]  ;;  %v60_v8 = vld [vmem:[%s657_s2 + $0x38] sm:$0xff] }
   0x4   :  { %419 = vmatpush.msra.mxu2 %v67_v1  ;;  %70 = vmatpush.msra.mxu0 %v67_v1  ;;  %v59_v9 = vld [vmem:[%s657_s2 + $0x30] sm:$0xff]  ;;  %v58_v10 = vld [vmem:[%s657_s2 + $0x28] sm:$0xff]  ;;  %v57_v11 = vld [vmem:[%s657_s2 + $0x20] sm:$0xff] }
   0x5   :  { %v56_v12 = vld [vmem:[%s657_s2 + $0x18] sm:$0xff]  ;;  %v55_v13 = vld [vmem:[%s657_s2 + $0x10] sm:$0xff]  ;;  %v54_v14 = vld [vmem:[%s657_s2 + $0x8] sm:$0xff] }
   0x6   :  { %420 = vmatpush.msra.mxu2 %v66_v2  ;;  %71 = vmatpush.msra.mxu0 %v66_v2  ;;  %v53_v15 = vld [vmem:[%s657_s2] sm:$0xff]  ;;  %v46_v18 = vld [vmem:[%s658_s1 + $0x48] sm:$0xff]  ;;  %v47_v20 = vld [vmem:[%s658_s1 + $0x50] sm:$0xff] }
   0x7   :  { %v45_v16 = vld [vmem:[%s658_s1 + $0x40] sm:$0xff]  ;;  %v38_v19 = vld [vmem:[%s658_s1 + $0x8] sm:$0xff]  ;;  %v39_v21 = vld [vmem:[%s658_s1 + $0x10] sm:$0xff] }
   0x8   :  { %421 = vmatpush.msra.mxu2 %v65_v3  ;;  %72 = vmatpush.msra.mxu0 %v65_v3  ;;  %v37_v17 = vld [vmem:[%s658_s1] sm:$0xff]  ;;  %v48_v22 = vld [vmem:[%s658_s1 + $0x58] sm:$0xff]  ;;  %v50_v26 = vld [vmem:[%s658_s1 + $0x68] sm:$0xff] }
   0x9   :  { %v40_v23 = vld [vmem:[%s658_s1 + $0x18] sm:$0xff]  ;;  %v49_v24 = vld [vmem:[%s658_s1 + $0x60] sm:$0xff]  ;;  %v42_v27 = vld [vmem:[%s658_s1 + $0x28] sm:$0xff] }
   0xa   :  { %422 = vmatpush.msra.mxu2 %v64_v4  ;;  %73 = vmatpush.msra.mxu0 %v64_v4  ;;  %v41_v25 = vld [vmem:[%s658_s1 + $0x20] sm:$0xff]  ;;  %v51_v28 = vld [vmem:[%s658_s1 + $0x70] sm:$0xff]  ;;  %v52_v30 = vld [vmem:[%s658_s1 + $0x78] sm:$0xff] }
   0xb   :  { %v43_v29 = vld [vmem:[%s658_s1 + $0x30] sm:$0xff]  ;;  %v44_v31 = vld [vmem:[%s658_s1 + $0x38] sm:$0xff]  ;;  %v410_v56 = vld [vmem:[%s660_s0] sm:$0xff] }
   0xc   :  { %423 = vmatpush.msra.mxu2 %v63_v5  ;;  %74 = vmatpush.msra.mxu0 %v63_v5  ;;  %v414_v57 = vld [vmem:[%s660_s0 + $0x20] sm:$0xff]  ;;  %v411_v58 = vld [vmem:[%s660_s0 + $0x8] sm:$0xff]  ;;  %v412_v60 = vld [vmem:[%s660_s0 + $0x10] sm:$0xff] }
   0xd   :  { %v415_v59 = vld [vmem:[%s660_s0 + $0x28] sm:$0xff]  ;;  %v416_v61 = vld [vmem:[%s660_s0 + $0x30] sm:$0xff]  ;;  %v413_v62 = vld [vmem:[%s660_s0 + $0x18] sm:$0xff] }
   0xe   :  { %424 = vmatpush.msra.mxu2 %v62_v6  ;;  %75 = vmatpush.msra.mxu0 %v62_v6  ;;  %v417_v63 = vld [vmem:[%s660_s0 + $0x38] sm:$0xff]  ;;  %v591_v0 = vld [vmem:[%s659_s3] ss:$0 sm:$0xff] }
  0x10   :  { %425 = vmatpush.msra.mxu2 %v61_v7  ;;  %76 = vmatpush.msra.mxu0 %v61_v7 }
  0x12   :  { %426 = vmatpush.msra.mxu2 %v60_v8  ;;  %77 = vmatpush.msra.mxu0 %v60_v8 }
  0x14   :  { %427 = vmatpush.msra.mxu2 %v59_v9  ;;  %78 = vmatpush.msra.mxu0 %v59_v9 }
  0x16   :  { %428 = vmatpush.msra.mxu2 %v58_v10  ;;  %79 = vmatpush.msra.mxu0 %v58_v10 }
  0x18   :  { %429 = vmatpush.msra.mxu2 %v57_v11  ;;  %80 = vmatpush.msra.mxu0 %v57_v11 }
  0x1a   :  { %430 = vmatpush.msra.mxu2 %v56_v12  ;;  %81 = vmatpush.msra.mxu0 %v56_v12 }
  0x1c   :  { %431 = vmatpush.msra.mxu2 %v55_v13  ;;  %82 = vmatpush.msra.mxu0 %v55_v13 }
  0x1e   :  { %432 = vmatpush.msra.mxu2 %v54_v14  ;;  %83 = vmatpush.msra.mxu0 %v54_v14 }
  0x20   :  { %433 = vmatpush.msra.mxu2 %v53_v15  ;;  %84 = vmatpush.msra.mxu0 %v53_v15 }
  0x21   :  { %109 = vmatmul.f32.vlgmr.msra.gmra.mxu2 %v45_v16  ;;  %85 = vmatmul.f32.vlgmr.msra.gmra.mxu0 %v37_v17 }
  0x29   :  { %112 = vmatmul.f32.gmra.mxu2 %v46_v18  ;;  %88 = vmatmul.f32.gmra.mxu0 %v38_v19 }
  0x31   :  { %115 = vmatmul.f32.gmra.mxu2 %v47_v20  ;;  %91 = vmatmul.f32.gmra.mxu0 %v39_v21 }
  0x39   :  { %118 = vmatmul.f32.gmra.mxu2 %v48_v22  ;;  %94 = vmatmul.f32.gmra.mxu0 %v40_v23 }
  0x41   :  { %121 = vmatmul.f32.gmra.mxu2 %v49_v24  ;;  %97 = vmatmul.f32.gmra.mxu0 %v41_v25 }
  0x49   :  { %124 = vmatmul.f32.gmra.mxu2 %v50_v26  ;;  %100 = vmatmul.f32.gmra.mxu0 %v42_v27 }
  0x51   :  { %127 = vmatmul.f32.gmra.mxu2 %v51_v28  ;;  %103 = vmatmul.f32.gmra.mxu0 %v43_v29 }
  0x59   :  { %130 = vmatmul.f32.gmra.mxu2 %v52_v30  ;;  %106 = vmatmul.f32.gmra.mxu0 %v44_v31 }
  0x9e   :  { %v86_v33 = vpop.f32.mrf.mxu0 }
  0xa4   :  { %v110_v32 = vpop.f32.mrf.mxu2 }
  0xa6   :  { %v89_v35 = vpop.f32.mrf.mxu0 }
  0xa7   :  { %v166_v55 = vpack.c.bf16 %v89_v35, %v86_v33 }
  0xac   :  { %v113_v34 = vpop.f32.mrf.mxu2 }
  0xad   :  { %v170_v50 = vpack.c.bf16 %v113_v34, %v110_v32 }
  0xae   :  { %v92_v37 = vpop.f32.mrf.mxu0 }
  0xb4   :  { %v116_v36 = vpop.f32.mrf.mxu2 }
  0xb6   :  { %v95_v39 = vpop.f32.mrf.mxu0 }
  0xb7   :  { %v167_v54 = vpack.c.bf16 %v95_v39, %v92_v37 }
  0xbc   :  { %v119_v38 = vpop.f32.mrf.mxu2 }
  0xbd   :  { %v171_v49 = vpack.c.bf16 %v119_v38, %v116_v36 }
  0xbe   :  { %v98_v41 = vpop.f32.mrf.mxu0 }
  0xc4   :  { %v122_v40 = vpop.f32.mrf.mxu2 }
  0xc6   :  { %v101_v44 = vpop.f32.mrf.mxu0 }
  0xc7   :  { %v168_v53 = vpack.c.bf16 %v101_v44, %v98_v41 }
  0xcc   :  { %v125_v42 = vpop.f32.mrf.mxu2 }
  0xcd   :  { %v172_v48 = vpack.c.bf16 %v125_v42, %v122_v40 }
  0xce   :  { %v104_v47 = vpop.f32.mrf.mxu0 }
  0xd4   :  { %v128_v43 = vpop.f32.mrf.mxu2 }
  0xd6   :  { %v107_v51 = vpop.f32.mrf.mxu0 }
  0xd7   :  { %v169_v52 = vpack.c.bf16 %v107_v51, %v104_v47 }
  0xdc   :  { %v131_v45 = vpop.f32.mrf.mxu2 }
  0xdd   :  { %v173_v46 = vpack.c.bf16 %v131_v45, %v128_v43 }
  0xdf   :  { %222 = vmatpush.bf16.msra.mxu1 %v173_v46  ;;  %434 = vmatpush.bf16.msra.mxu3 %v173_v46 }
  0xe3   :  { %223 = vmatpush.bf16.msra.mxu1 %v172_v48  ;;  %435 = vmatpush.bf16.msra.mxu3 %v172_v48 }
  0xe7   :  { %224 = vmatpush.bf16.msra.mxu1 %v171_v49  ;;  %436 = vmatpush.bf16.msra.mxu3 %v171_v49 }
  0xeb   :  { %225 = vmatpush.bf16.msra.mxu1 %v170_v50  ;;  %437 = vmatpush.bf16.msra.mxu3 %v170_v50 }
  0xef   :  { %226 = vmatpush.bf16.msra.mxu1 %v169_v52  ;;  %438 = vmatpush.bf16.msra.mxu3 %v169_v52 }
  0xf3   :  { %227 = vmatpush.bf16.msra.mxu1 %v168_v53  ;;  %439 = vmatpush.bf16.msra.mxu3 %v168_v53 }
  0xf7   :  { %228 = vmatpush.bf16.msra.mxu1 %v167_v54  ;;  %440 = vmatpush.bf16.msra.mxu3 %v167_v54 }
  0xfb   :  { %229 = vmatpush.bf16.msra.mxu1 %v166_v55  ;;  %441 = vmatpush.bf16.msra.mxu3 %v166_v55 }
  0xfe   :  { %230 = vmatmul.bf16.vlgmr.msra.gmra.mxu1 %v410_v56  ;;  %250 = vmatmul.bf16.vlgmr.msra.gmra.mxu3 %v414_v57 }
 0x10e   :  { %235 = vmatmul.bf16.gmra.mxu1 %v411_v58  ;;  %255 = vmatmul.bf16.gmra.mxu3 %v415_v59 }
 0x11e   :  { %240 = vmatmul.bf16.gmra.mxu1 %v412_v60  ;;  %260 = vmatmul.bf16.gmra.mxu3 %v416_v61 }
 0x12e   :  { %245 = vmatmul.bf16.gmra.mxu1 %v413_v62  ;;  %265 = vmatmul.bf16.gmra.mxu3 %v417_v63 }
 0x17b   :  { %v231_v1 = vpop.f32.mrf.mxu1 }
 0x17c   :  { %v326_v2 = vadd.f32 %v591_v0, %v231_v1 }
 0x17e   :  { %v342_v3 = vmax.f32 %v326_v2, 0.0 }
 0x180   :  { %358 = vst [vmem:[%s661_s4] sm:$0xff] %v342_v3 }
 0x181   :  { %v251_v4 = vpop.f32.mrf.mxu3 }
 0x182   :  { %v334_v5 = vadd.f32 %v591_v0, %v251_v4 }
 0x183   :  { %v233_v6 = vpop.f32.mrf.mxu1 }
 0x184   :  { %v350_v7 = vmax.f32 %v334_v5, 0.0  ;;  %v327_v8 = vadd.f32 %v591_v0, %v233_v6 }
 0x186   :  { %366 = vst [vmem:[%s661_s4 + $0x40] sm:$0xff] %v350_v7  ;;  %v343_v9 = vmax.f32 %v327_v8, 0.0 }
 0x188   :  { %359 = vst [vmem:[%s661_s4 + $0x8] sm:$0xff] %v343_v9 }
 0x189   :  { %v253_v10 = vpop.f32.mrf.mxu3 }
 0x18a   :  { %v335_v11 = vadd.f32 %v591_v0, %v253_v10 }
 0x18b   :  { %v236_v12 = vpop.f32.mrf.mxu1 }
 0x18c   :  { %v351_v13 = vmax.f32 %v335_v11, 0.0  ;;  %v328_v14 = vadd.f32 %v591_v0, %v236_v12 }
 0x18e   :  { %367 = vst [vmem:[%s661_s4 + $0x48] sm:$0xff] %v351_v13  ;;  %v344_v15 = vmax.f32 %v328_v14, 0.0 }
 0x190   :  { %360 = vst [vmem:[%s661_s4 + $0x10] sm:$0xff] %v344_v15 }
 0x191   :  { %v256_v16 = vpop.f32.mrf.mxu3 }
 0x192   :  { %v336_v17 = vadd.f32 %v591_v0, %v256_v16 }
 0x193   :  { %v238_v18 = vpop.f32.mrf.mxu1 }
 0x194   :  { %v352_v19 = vmax.f32 %v336_v17, 0.0  ;;  %v329_v20 = vadd.f32 %v591_v0, %v238_v18 }
 0x196   :  { %368 = vst [vmem:[%s661_s4 + $0x50] sm:$0xff] %v352_v19  ;;  %v345_v21 = vmax.f32 %v329_v20, 0.0 }
 0x198   :  { %361 = vst [vmem:[%s661_s4 + $0x18] sm:$0xff] %v345_v21 }
 0x199   :  { %v258_v22 = vpop.f32.mrf.mxu3 }
 0x19a   :  { %v337_v23 = vadd.f32 %v591_v0, %v258_v22 }
 0x19b   :  { %v241_v24 = vpop.f32.mrf.mxu1 }
 0x19c   :  { %v353_v25 = vmax.f32 %v337_v23, 0.0  ;;  %v330_v26 = vadd.f32 %v591_v0, %v241_v24 }
 0x19e   :  { %369 = vst [vmem:[%s661_s4 + $0x58] sm:$0xff] %v353_v25  ;;  %v346_v27 = vmax.f32 %v330_v26, 0.0 }
 0x1a0   :  { %362 = vst [vmem:[%s661_s4 + $0x20] sm:$0xff] %v346_v27 }
 0x1a1   :  { %v261_v28 = vpop.f32.mrf.mxu3 }
 0x1a2   :  { %v338_v29 = vadd.f32 %v591_v0, %v261_v28 }
 0x1a3   :  { %v243_v30 = vpop.f32.mrf.mxu1 }
 0x1a4   :  { %v354_v31 = vmax.f32 %v338_v29, 0.0  ;;  %v331_v32 = vadd.f32 %v591_v0, %v243_v30 }
 0x1a6   :  { %370 = vst [vmem:[%s661_s4 + $0x60] sm:$0xff] %v354_v31  ;;  %v347_v33 = vmax.f32 %v331_v32, 0.0 }
 0x1a8   :  { %363 = vst [vmem:[%s661_s4 + $0x28] sm:$0xff] %v347_v33 }
 0x1a9   :  { %v263_v34 = vpop.f32.mrf.mxu3 }
 0x1aa   :  { %v339_v35 = vadd.f32 %v591_v0, %v263_v34 }
 0x1ab   :  { %v246_v36 = vpop.f32.mrf.mxu1 }
 0x1ac   :  { %v355_v37 = vmax.f32 %v339_v35, 0.0  ;;  %v332_v38 = vadd.f32 %v591_v0, %v246_v36 }
 0x1ae   :  { %371 = vst [vmem:[%s661_s4 + $0x68] sm:$0xff] %v355_v37  ;;  %v348_v39 = vmax.f32 %v332_v38, 0.0 }
 0x1b0   :  { %364 = vst [vmem:[%s661_s4 + $0x30] sm:$0xff] %v348_v39 }
 0x1b1   :  { %v266_v40 = vpop.f32.mrf.mxu3 }
 0x1b2   :  { %v340_v41 = vadd.f32 %v591_v0, %v266_v40 }
 0x1b3   :  { %v248_v42 = vpop.f32.mrf.mxu1 }
 0x1b4   :  { %v356_v43 = vmax.f32 %v340_v41, 0.0  ;;  %v333_v44 = vadd.f32 %v591_v0, %v248_v42 }
 0x1b6   :  { %372 = vst [vmem:[%s661_s4 + $0x70] sm:$0xff] %v356_v43  ;;  %v349_v45 = vmax.f32 %v333_v44, 0.0 }
 0x1b8   :  { %365 = vst [vmem:[%s661_s4 + $0x38] sm:$0xff] %v349_v45 }
 0x1b9   :  { %v268_v46 = vpop.f32.mrf.mxu3 }
 0x1ba   :  { %v341_v47 = vadd.f32 %v591_v0, %v268_v46 }
 0x1bc   :  { %v357_v48 = vmax.f32 %v341_v47, 0.0 }
 0x1be   :  { %373 = vst [vmem:[%s661_s4 + $0x78] sm:$0xff] %v357_v48 }

</bundles_post_ra>
